<compile_context>
chip_gen: v7x
topology: tpu7x:2x2x1
jax: 0.10.0
libtpu: 0.0.40
codegen_flags: <defaults>
</compile_context>

<pallas_src>
import jax
import jax.numpy as jnp
from jax.experimental import pallas as pl
from jax.experimental.pallas import tpu as pltpu

HIDDEN = 256
LANE_PAD = 128  # pad dim_out up to a multiple of 128 for lane-dense stores


def actor_kernel(x_ref, w1_ref, b1_ref, w2_ref, b2_ref, w3_ref, b3_ref, o_ref):
    # x_ref: [B, dim_in] bf16, weights bf16, biases f32, o_ref: [B, dim_out_padded] f32
    x = x_ref[...]

    # fc1 + ReLU (bf16 MXU operands, f32 accumulation)
    h1 = jnp.dot(x, w1_ref[...], preferred_element_type=jnp.float32) + b1_ref[...]
    h1 = jnp.maximum(h1, 0.0).astype(jnp.bfloat16)

    # fc2 + ReLU
    h2 = jnp.dot(h1, w2_ref[...], preferred_element_type=jnp.float32) + b2_ref[...]
    h2 = jnp.maximum(h2, 0.0).astype(jnp.bfloat16)

    # fc3 + ReLU (lane-padded to 128 output columns; padded cols are exactly 0)
    h3 = jnp.dot(h2, w3_ref[...], preferred_element_type=jnp.float32) + b3_ref[...]
    h3 = jnp.maximum(h3, 0.0)

    # Softmax over axis 0 (matches nn.Softmax(0) on a [B, dim_out] tensor).
    # Padded columns produce a uniform softmax and are sliced away in the wrapper;
    # they cannot affect real columns because the reduction is per-column.
    m = jnp.max(h3, axis=0, keepdims=True)
    e = jnp.exp(h3 - m)
    s = jnp.sum(e, axis=0, keepdims=True)
    o_ref[...] = (e * pl.reciprocal(s, approx=False)).astype(o_ref.dtype)


def net_actor_discrete(x, kparams, dim_out):
    """Forward pass.

    x: [N_env, B, dim_in] (or [B, dim_in]) float32/bfloat16.
    kparams: dict with bf16 weights (w3/b3 lane-padded to 128) — see prepare_params().
    Returns: [N_env, B, dim_out] (or [B, dim_out]) float32 probabilities
             (softmax over the B axis of each env block, as in nn.Softmax(0)).
    """
    squeeze = x.ndim == 2
    if squeeze:
        x = x[None]
    n_env, batch, dim_in = x.shape
    d_pad = kparams["w3"].shape[1]

    x_bf16 = x.astype(jnp.bfloat16)

    flops = 2 * n_env * batch * (dim_in * HIDDEN + HIDDEN * HIDDEN + HIDDEN * d_pad)
    transcendentals = n_env * batch * d_pad  # exp in the softmax
    bytes_accessed = (
        n_env * batch * dim_in * 2                                  # x (bf16)
        + (dim_in * HIDDEN + HIDDEN * HIDDEN + HIDDEN * d_pad) * 2  # weights (bf16)
        + (HIDDEN + HIDDEN + d_pad) * 4                             # biases (f32)
        + n_env * batch * d_pad * 4                                 # output (f32)
    )

    out = pl.pallas_call(
        actor_kernel,
        out_shape=jax.ShapeDtypeStruct((n_env, batch, d_pad), jnp.float32),
        grid_spec=pltpu.PrefetchScalarGridSpec(
            num_scalar_prefetch=0,
            grid=(n_env,),
            in_specs=[
                # per-env activation block (env axis squeezed out inside the kernel)
                pl.BlockSpec((None, batch, dim_in), lambda e: (e, 0, 0)),
                # weights/biases: constant block index -> stay resident in VMEM across steps
                pl.BlockSpec((dim_in, HIDDEN), lambda e: (0, 0)),
                pl.BlockSpec((1, HIDDEN), lambda e: (0, 0)),
                pl.BlockSpec((HIDDEN, HIDDEN), lambda e: (0, 0)),
                pl.BlockSpec((1, HIDDEN), lambda e: (0, 0)),
                pl.BlockSpec((HIDDEN, d_pad), lambda e: (0, 0)),
                pl.BlockSpec((1, d_pad), lambda e: (0, 0)),
            ],
            out_specs=pl.BlockSpec((None, batch, d_pad), lambda e: (e, 0, 0)),
        ),
        compiler_params=pltpu.CompilerParams(dimension_semantics=("parallel",)),
        cost_estimate=pl.CostEstimate(
            flops=flops,
            transcendentals=transcendentals,
            bytes_accessed=bytes_accessed,
        ),
    )(
        x_bf16,
        kparams["w1"], kparams["b1"],
        kparams["w2"], kparams["b2"],
        kparams["w3"], kparams["b3"],
    )

    out = out[..., :dim_out]
    return out[0] if squeeze else out


def init_params(key, dim_in, dim_out):
    """f32 params mimicking PyTorch Linear default init: U(-1/sqrt(fan_in), 1/sqrt(fan_in)).
    Weights are stored transposed vs PyTorch ([in, out]) so the kernel computes x @ W + b."""
    ks = jax.random.split(key, 6)

    def linear(kw, kb, fan_in, fan_out):
        bound = 1.0 / jnp.sqrt(jnp.float32(fan_in))
        w = jax.random.uniform(kw, (fan_in, fan_out), jnp.float32, -bound, bound)
        b = jax.random.uniform(kb, (1, fan_out), jnp.float32, -bound, bound)
        return w, b

    w1, b1 = linear(ks[0], ks[1], dim_in, HIDDEN)
    w2, b2 = linear(ks[2], ks[3], HIDDEN, HIDDEN)
    w3, b3 = linear(ks[4], ks[5], HIDDEN, dim_out)
    return {"w1": w1, "b1": b1, "w2": w2, "b2": b2, "w3": w3, "b3": b3}


def prepare_params(p_f32, dim_out):
    """Cast matmul weights to bf16 and zero-pad the fc3 weight/bias to a 128-lane-dense width."""
    d_pad = ((dim_out + LANE_PAD - 1) // LANE_PAD) * LANE_PAD
    w3p = jnp.zeros((HIDDEN, d_pad), jnp.float32).at[:, :dim_out].set(p_f32["w3"])
    b3p = jnp.zeros((1, d_pad), jnp.float32).at[:, :dim_out].set(p_f32["b3"])
    return {
        "w1": p_f32["w1"].astype(jnp.bfloat16),
        "b1": p_f32["b1"],
        "w2": p_f32["w2"].astype(jnp.bfloat16),
        "b2": p_f32["b2"],
        "w3": w3p.astype(jnp.bfloat16),
        "b3": b3p,
    }


def reference_forward(x, p):
    """Pure-JAX reference using the same bf16-operand / f32-accumulate arithmetic."""
    xb = x.astype(jnp.bfloat16)
    w1 = p["w1"].astype(jnp.bfloat16)
    w2 = p["w2"].astype(jnp.bfloat16)
    w3 = p["w3"].astype(jnp.bfloat16)
    h1 = jnp.maximum(jnp.dot(xb, w1, preferred_element_type=jnp.float32) + p["b1"], 0.0)
    h2 = jnp.maximum(
        jnp.dot(h1.astype(jnp.bfloat16), w2, preferred_element_type=jnp.float32) + p["b2"], 0.0)
    h3 = jnp.maximum(
        jnp.dot(h2.astype(jnp.bfloat16), w3, preferred_element_type=jnp.float32) + p["b3"], 0.0)
    return jax.nn.softmax(h3, axis=-2)  # softmax over the B axis (nn.Softmax(0) per env block)


if __name__ == "__main__":
    N_ENV, B, DIM_IN, DIM_OUT = 4, 8, 32, 8
    key = jax.random.PRNGKey(0)
    k_x, k_p = jax.random.split(key)

    x = jax.random.normal(k_x, (N_ENV, B, DIM_IN), jnp.float32)
    params_f32 = init_params(k_p, DIM_IN, DIM_OUT)
    kparams = prepare_params(params_f32, DIM_OUT)

    out = net_actor_discrete(x, kparams, DIM_OUT)
    out = jax.block_until_ready(out)

    ref = jax.block_until_ready(reference_forward(x, params_f32))
    assert out.shape == (N_ENV, B, DIM_OUT), f"bad shape {out.shape}"
    assert jnp.allclose(out, ref, atol=2e-3, rtol=2e-3), "mismatch vs JAX reference"
    # softmax over axis 0 of each env block -> per-column sums are 1
    assert jnp.allclose(jnp.sum(out, axis=1), jnp.ones((N_ENV, DIM_OUT)), atol=1e-5)

    print("KERNEL_OK")
</pallas_src>

<mosaic_0001>
module attributes {stable_mosaic.version = 11 : i64} {
  func.func @actor_kernel(%arg0: i32, %arg1: memref<1x8x32xbf16, #tpu.memory_space<vmem>>, %arg2: memref<32x256xbf16, #tpu.memory_space<vmem>>, %arg3: memref<1x256xf32, #tpu.memory_space<vmem>>, %arg4: memref<256x256xbf16, #tpu.memory_space<vmem>>, %arg5: memref<1x256xf32, #tpu.memory_space<vmem>>, %arg6: memref<256x128xbf16, #tpu.memory_space<vmem>>, %arg7: memref<1x128xf32, #tpu.memory_space<vmem>>, %arg8: memref<1x8x128xf32, #tpu.memory_space<vmem>>) attributes {dimension_semantics = [#tpu.dimension_semantics<parallel>], iteration_bounds = array<i64: 4>, scalar_prefetch = 0 : i64, scratch_operands = 0 : i64, tpu.core_type = #tpu.core_type<tc>, window_params = [{transform_indices = @transform_0, window_bounds = array<i64: 1, 8, 32>}, {pipeline_mode = #tpu.pipeline_mode<synchronous>, transform_indices = @transform_1, window_bounds = array<i64: 32, 256>}, {pipeline_mode = #tpu.pipeline_mode<synchronous>, transform_indices = @transform_2, window_bounds = array<i64: 1, 256>}, {pipeline_mode = #tpu.pipeline_mode<synchronous>, transform_indices = @transform_3, window_bounds = array<i64: 256, 256>}, {pipeline_mode = #tpu.pipeline_mode<synchronous>, transform_indices = @transform_4, window_bounds = array<i64: 1, 256>}, {pipeline_mode = #tpu.pipeline_mode<synchronous>, transform_indices = @transform_5, window_bounds = array<i64: 256, 128>}, {pipeline_mode = #tpu.pipeline_mode<synchronous>, transform_indices = @transform_6, window_bounds = array<i64: 1, 128>}, {transform_indices = @transform_7, window_bounds = array<i64: 1, 8, 128>}]} {
    %c0 = arith.constant 0 : index
    %c0_0 = arith.constant 0 : index
    %c0_1 = arith.constant 0 : index
    %0 = vector.load %arg1[%c0, %c0_0, %c0_1] : memref<1x8x32xbf16, #tpu.memory_space<vmem>>, vector<1x8x32xbf16>
    %1 = vector.shape_cast %0 : vector<1x8x32xbf16> to vector<8x32xbf16>
    %c0_2 = arith.constant 0 : index
    %c0_3 = arith.constant 0 : index
    %2 = vector.load %arg2[%c0_2, %c0_3] : memref<32x256xbf16, #tpu.memory_space<vmem>>, vector<32x256xbf16>
    %cst = arith.constant dense<0.000000e+00> : vector<8x256xf32>
    %3 = tpu.matmul %1, %2, %cst {dimension_numbers = #tpu.dot_dimension_numbers<[1], [0], [0], [1], [0, 0, 1, 1], [], []>} : vector<8x32xbf16>, vector<32x256xbf16>, vector<8x256xf32> -> vector<8x256xf32>
    %c0_4 = arith.constant 0 : index
    %c0_5 = arith.constant 0 : index
    %4 = vector.load %arg3[%c0_4, %c0_5] : memref<1x256xf32, #tpu.memory_space<vmem>>, vector<1x256xf32>
    %5 = vector.broadcast %4 : vector<1x256xf32> to vector<8x256xf32>
    %6 = arith.addf %3, %5 : vector<8x256xf32>
    %cst_6 = arith.constant 0.000000e+00 : f32
    %7 = vector.broadcast %cst_6 : f32 to vector<8x256xf32>
    %8 = arith.maximumf %6, %7 : vector<8x256xf32>
    %9 = arith.truncf %8 : vector<8x256xf32> to vector<8x256xbf16>
    %c0_7 = arith.constant 0 : index
    %c0_8 = arith.constant 0 : index
    %10 = vector.load %arg4[%c0_7, %c0_8] : memref<256x256xbf16, #tpu.memory_space<vmem>>, vector<256x256xbf16>
    %cst_9 = arith.constant dense<0.000000e+00> : vector<8x256xf32>
    %11 = tpu.matmul %9, %10, %cst_9 {dimension_numbers = #tpu.dot_dimension_numbers<[1], [0], [0], [1], [0, 0, 1, 1], [], []>} : vector<8x256xbf16>, vector<256x256xbf16>, vector<8x256xf32> -> vector<8x256xf32>
    %c0_10 = arith.constant 0 : index
    %c0_11 = arith.constant 0 : index
    %12 = vector.load %arg5[%c0_10, %c0_11] : memref<1x256xf32, #tpu.memory_space<vmem>>, vector<1x256xf32>
    %13 = vector.broadcast %12 : vector<1x256xf32> to vector<8x256xf32>
    %14 = arith.addf %11, %13 : vector<8x256xf32>
    %cst_12 = arith.constant 0.000000e+00 : f32
    %15 = vector.broadcast %cst_12 : f32 to vector<8x256xf32>
    %16 = arith.maximumf %14, %15 : vector<8x256xf32>
    %17 = arith.truncf %16 : vector<8x256xf32> to vector<8x256xbf16>
    %c0_13 = arith.constant 0 : index
    %c0_14 = arith.constant 0 : index
    %18 = vector.load %arg6[%c0_13, %c0_14] : memref<256x128xbf16, #tpu.memory_space<vmem>>, vector<256x128xbf16>
    %cst_15 = arith.constant dense<0.000000e+00> : vector<8x128xf32>
    %19 = tpu.matmul %17, %18, %cst_15 {dimension_numbers = #tpu.dot_dimension_numbers<[1], [0], [0], [1], [0, 0, 1, 1], [], []>} : vector<8x256xbf16>, vector<256x128xbf16>, vector<8x128xf32> -> vector<8x128xf32>
    %c0_16 = arith.constant 0 : index
    %c0_17 = arith.constant 0 : index
    %20 = vector.load %arg7[%c0_16, %c0_17] : memref<1x128xf32, #tpu.memory_space<vmem>>, vector<1x128xf32>
    %21 = vector.broadcast %20 : vector<1x128xf32> to vector<8x128xf32>
    %22 = arith.addf %19, %21 : vector<8x128xf32>
    %cst_18 = arith.constant 0.000000e+00 : f32
    %23 = vector.broadcast %cst_18 : f32 to vector<8x128xf32>
    %24 = arith.maximumf %22, %23 : vector<8x128xf32>
    %cst_19 = arith.constant dense<0xFF800000> : vector<128xf32>
    %25 = vector.multi_reduction <maximumf>, %24, %cst_19 [0] : vector<8x128xf32> to vector<128xf32>
    %26 = vector.shape_cast %25 : vector<128xf32> to vector<1x128xf32>
    %27 = vector.broadcast %26 : vector<1x128xf32> to vector<8x128xf32>
    %28 = arith.subf %24, %27 : vector<8x128xf32>
    %29 = math.exp %28 : vector<8x128xf32>
    %cst_20 = arith.constant dense<0.000000e+00> : vector<128xf32>
    %30 = vector.multi_reduction <add>, %29, %cst_20 [0] : vector<8x128xf32> to vector<128xf32>
    %31 = vector.shape_cast %30 : vector<128xf32> to vector<1x128xf32>
    %32 = tpu.reciprocal %31 : vector<1x128xf32> -> vector<1x128xf32>
    %33 = vector.broadcast %32 : vector<1x128xf32> to vector<8x128xf32>
    %34 = arith.mulf %29, %33 : vector<8x128xf32>
    %c0_21 = arith.constant 0 : index
    %c0_22 = arith.constant 0 : index
    %c0_23 = arith.constant 0 : index
    %35 = vector.load %arg8[%c0_21, %c0_22, %c0_23] : memref<1x8x128xf32, #tpu.memory_space<vmem>>, vector<1x8x128xf32>
    %36 = vector.shape_cast %35 : vector<1x8x128xf32> to vector<8x128xf32>
    %37 = vector.shape_cast %34 : vector<8x128xf32> to vector<1x8x128xf32>
    tpu.vector_store %arg8[%c0_21, %c0_22, %c0_23], %37 {strides = array<i32>} : memref<1x8x128xf32, #tpu.memory_space<vmem>>, vector<1x8x128xf32>,
    return
  }
  func.func @transform_0(%arg0: i32) -> (i32, i32, i32) {
    %c0_i32 = arith.constant 0 : i32
    %c0_i32_0 = arith.constant 0 : i32
    %c0_i32_1 = arith.constant 0 : i32
    return %arg0, %c0_i32, %c0_i32_0 : i32, i32, i32
  }
  func.func @transform_1(%arg0: i32) -> (i32, i32) {
    %c0_i32 = arith.constant 0 : i32
    %c0_i32_0 = arith.constant 0 : i32
    %c0_i32_1 = arith.constant 0 : i32
    return %c0_i32, %c0_i32_0 : i32, i32
  }
  func.func @transform_2(%arg0: i32) -> (i32, i32) {
    %c0_i32 = arith.constant 0 : i32
    %c0_i32_0 = arith.constant 0 : i32
    %c0_i32_1 = arith.constant 0 : i32
    return %c0_i32, %c0_i32_0 : i32, i32
  }
  func.func @transform_3(%arg0: i32) -> (i32, i32) {
    %c0_i32 = arith.constant 0 : i32
    %c0_i32_0 = arith.constant 0 : i32
    %c0_i32_1 = arith.constant 0 : i32
    return %c0_i32, %c0_i32_0 : i32, i32
  }
  func.func @transform_4(%arg0: i32) -> (i32, i32) {
    %c0_i32 = arith.constant 0 : i32
    %c0_i32_0 = arith.constant 0 : i32
    %c0_i32_1 = arith.constant 0 : i32
    return %c0_i32, %c0_i32_0 : i32, i32
  }
  func.func @transform_5(%arg0: i32) -> (i32, i32) {
    %c0_i32 = arith.constant 0 : i32
    %c0_i32_0 = arith.constant 0 : i32
    %c0_i32_1 = arith.constant 0 : i32
    return %c0_i32, %c0_i32_0 : i32, i32
  }
  func.func @transform_6(%arg0: i32) -> (i32, i32) {
    %c0_i32 = arith.constant 0 : i32
    %c0_i32_0 = arith.constant 0 : i32
    %c0_i32_1 = arith.constant 0 : i32
    return %c0_i32, %c0_i32_0 : i32, i32
  }
  func.func @transform_7(%arg0: i32) -> (i32, i32, i32) {
    %c0_i32 = arith.constant 0 : i32
    %c0_i32_0 = arith.constant 0 : i32
    %c0_i32_1 = arith.constant 0 : i32
    return %arg0, %c0_i32, %c0_i32_0 : i32, i32, i32
  }
}

</mosaic_0001>

<bundles_post_ra>
// kernel: tpu_custom_call.1
= control target key start
LH: loop header
LB: loop body
LE: loop exit
PB: predicated region body
PF: predicated region fallthrough
CT: control target
= control target key end

     0   :  { %12 = vsyncpa [#allocation3], 0  ;;  %s1733_s0 = inlined_call_operand.hbm [shape: bf16[4,8,32], index: 0, kind: input, shape index: {}]   ;;  %s1734_s1 = inlined_call_operand.hbm [shape: bf16[32,256], index: 1, kind: input, shape index: {}]   ;;  %s1735_s2 = inlined_call_operand.vmem [shape: f32[1,256], index: 2, kind: input, shape index: {}]   ;;  %s1736_s3 = inlined_call_operand.hbm [shape: bf16[256,256], index: 3, kind: input, shape index: {}]   ;;  %s1737_s4 = inlined_call_operand.vmem [shape: f32[1,256], index: 4, kind: input, shape index: {}]   ;;  %s1738_s5 = inlined_call_operand.hbm [shape: bf16[256,128], index: 5, kind: input, shape index: {}]   ;;  %s1739_s6 = inlined_call_operand.vmem [shape: f32[1,128], index: 6, kind: input, shape index: {}]   ;;  %s1740_s7 = inlined_call_operand.hbm [shape: f32[4,8,128], index: 7, kind: output, shape index: {}]  }
   0x1   :  { %14 = vsyncpa [#allocation3 + $0x1], 0 }
   0x2   :  { %15 = vsyncpa [#allocation6], 0 }
   0x3   :  { %16 = vsyncpa [#allocation9], 0 }
   0x4   :  { %17 = vsyncpa [#allocation4], 0 }
   0x5   :  { %19 = vsyncpa [#allocation4 + $0x1], 0  ;;  %s1471_s24 = smov 0   ;;  %s1473_s25 = smov 0  }
   0x6   :  { %s1475_s26 = smov 0   ;;  %s1477_s27 = smov 0  }
   0x7 LB: > { %s1492_s28 = sadd.s32 4294967295, %s1419_s27   ;;  %s981_s29 = sadd.s32 4294967294, %s1419_s27   ;;  %s1419_s27 = sphi %s1477_s27, %s1765_s27   ;;  %s1415_s26 = sphi %s1475_s26, %s1764_s26   ;;  %s1411_s25 = sphi %s1473_s25, %s1763_s25   ;;  %s1407_s24 = sphi %s1471_s24, %s1762_s24  }
   0x8   : > { %p45_p0 = scmp.ne.s32.totalorder %s1411_s25, %s1407_s24  ;;  %p1741_p1 = scmp.eq.s32.totalorder %s1492_s28, 0 }
   0x9   : > { %p201_p3 = scmp.eq.s32.totalorder %s981_s29, 3  ;;  %p982_p5 = scmp.ge.s32.totalorder %s1419_s27, 1 }
   0xa   : > { %p1501_p4 = por %p1741_p1, %p45_p0  ;;  %p208_p7 = scmp.lt.s32.totalorder %s1419_s27, 5 }
   0xb   : > { %p1506_p6 = por %p201_p3, %p45_p0  ;;  %s1421_s10 = smov [#allocation5]  }
   0xc   : > { %s1745_s30 = scalar_select %p1501_p4, 1, 0 }
   0xd   : > { %s1746_s8 = scalar_select %p1506_p6, 1, 0 }
   0xe   : > { %p1511_p8 = pnand %p982_p5, %p208_p7  ;;  %s220_s11 = sshll.u32 %s1421_s10, 4  ;;  %s1515_s11 = int_to_ptr.vmem [resolvable:$true] %s220_s11 }
   0xf   : > { %1747 = sst [smem:[#allocation15_spill]] %s1746_s8  ;;  %s1422_s13 = smov [#allocation7]  }
  0x10   : > { %s1748_s9 = scalar_select %p1511_p8, 1, 0 }
  0x11   : > { %p1091_p9 = pneg %p1511_p8  ;;  %s236_s14 = sshll.u32 %s1422_s13, 4  ;;  %s1525_s14 = int_to_ptr.vmem [resolvable:$true] %s236_s14 }
  0x12   : > { %s1423_s15 = smov [#allocation8]   ;;  %s1231_s19 = scalar_lea.hbm %s1734_s1, 512 }
  0x13   : > { %p1521_p10 = pnand %p1091_p9, %p1741_p1  ;;  %s1527_s16 = sshll.u32 %s1423_s15, 4  ;;  %s253_s16 = int_to_ptr.vmem [resolvable:$true] %s1527_s16 }
  0x14   : > { %p1232_p11 = scmp.ne.s32.totalorder %s1734_s1, %s1231_s19  ;;  %p1238_p3 = scmp.lt.u32.totalorder %s1231_s19, %s1734_s1 }
  0x15   : > { %p1537_p12 = pneg %p1521_p10 }
  0x17   : > { %p1234_p13 = pnand %p1537_p12, %p1232_p11 }
  0x19   : > { %p1235_p0 = pneg %p1234_p13 }
  0x1b   : > { %p1240_p5 = pnand %p1238_p3, %p1235_p0 }
  0x1d   : > { %1243 = shalt.err (!%p1240_p5)
}
  0x1e   : > { %s1244_s10 = scalar_lea.vmem %s1515_s11, 512  ;;  %p1252_p2 = scmp.lt.s32.totalorder %s1515_s11, %s1515_s11 }
  0x1f   : > { %p1245_p7 = scmp.ne.s32.totalorder %s1515_s11, %s1244_s10  ;;  %p1253_p6 = scmp.lt.s32.totalorder %s1244_s10, %s1244_s10 }
  0x21   : > { %p1247_p9 = pnand %p1245_p7, %p1537_p12  ;;  %p1254_p11 = por %p1253_p6, %p1252_p2 }
  0x23   : > { %p1248_p1 = pneg %p1247_p9 }
  0x25   : > { %p1255_p13 = pnand %p1254_p11, %p1248_p1 }
  0x27   : > { %1258 = shalt.err (!%p1255_p13)
}
  0x28   : > { %s1424_s13 = smov 128   ;;  %s1425_s15 = smov 8  }
  0x29   : > { %1094 = dma.hbm_to_vmem [thread:$0]  (!%p1521_p10), %s1734_s1, 512, %s1515_s11, [#allocation6], %s1424_s13, %s1424_s13, %s1425_s15  }
  0x2a   : > { %s1259_s21 = scalar_lea.hbm %s1736_s3, 4096 }
  0x2b   : > { %p1260_p2 = scmp.ne.s32.totalorder %s1736_s3, %s1259_s21  ;;  %p1266_p0 = scmp.lt.u32.totalorder %s1259_s21, %s1736_s3 }
  0x2d   : > { %p1262_p1 = pnand %p1260_p2, %p1537_p12 }
  0x2f   : > { %p1263_p6 = pneg %p1262_p1 }
  0x31   : > { %p1268_p3 = pnand %p1266_p0, %p1263_p6 }
  0x33   : > { %1271 = shalt.err (!%p1268_p3)
}
  0x34   : > { %s1272_s11 = scalar_lea.vmem %s1525_s14, 4096  ;;  %p1280_p11 = scmp.lt.s32.totalorder %s1525_s14, %s1525_s14 }
  0x35   : > { %p1273_p5 = scmp.ne.s32.totalorder %s1525_s14, %s1272_s11  ;;  %p1281_p13 = scmp.lt.s32.totalorder %s1272_s11, %s1272_s11 }
  0x37   : > { %p1275_p7 = pnand %p1273_p5, %p1537_p12  ;;  %p1282_p2 = por %p1281_p13, %p1280_p11 }
  0x39   : > { %p1276_p9 = pneg %p1275_p7 }
  0x3b   : > { %p1283_p1 = pnand %p1282_p2, %p1276_p9 }
  0x3d   : > { %1286 = shalt.err (!%p1283_p1)
}
  0x3e   : > { %1097 = dma.hbm_to_vmem [thread:$0]  (!%p1521_p10), %s1736_s3, 4096, %s1525_s14, [#allocation6], %s1424_s13, %s1424_s13, %s1425_s15  }
  0x3f   : > { %s1287_s20 = scalar_lea.hbm %s1738_s5, 2048 }
  0x40   : > { %p1288_p6 = scmp.ne.s32.totalorder %s1738_s5, %s1287_s20  ;;  %p1294_p5 = scmp.lt.u32.totalorder %s1287_s20, %s1738_s5 }
  0x42   : > { %p1290_p0 = pnand %p1288_p6, %p1537_p12 }
  0x44   : > { %p1291_p3 = pneg %p1290_p0 }
  0x46   : > { %p1296_p7 = pnand %p1294_p5, %p1291_p3 }
  0x48   : > { %1299 = shalt.err (!%p1296_p7)
}
  0x49   : > { %s1300_s11 = scalar_lea.vmem %s253_s16, 2048  ;;  %p1308_p2 = scmp.lt.s32.totalorder %s253_s16, %s253_s16 }
  0x4a   : > { %p1301_p9 = scmp.ne.s32.totalorder %s253_s16, %s1300_s11  ;;  %p1309_p1 = scmp.lt.s32.totalorder %s1300_s11, %s1300_s11 }
  0x4c   : > { %p1303_p11 = pnand %p1301_p9, %p1537_p12  ;;  %p1310_p4 = por %p1309_p1, %p1308_p2 }
  0x4e   : > { %p1304_p13 = pneg %p1303_p11 }
  0x50   : > { %p1311_p8 = pnand %p1310_p4, %p1304_p13 }
  0x52   : > { %1314 = shalt.err (!%p1311_p8)
}
  0x53   : > { %s1426_s14 = smov 64   ;;  %s1427_s22 = smov 4  }
  0x54   : > { %1100 = dma.hbm_to_vmem [thread:$0]  (!%p1521_p10), %s1738_s5, 2048, %s253_s16, [#allocation9], %s1426_s14, %s1426_s14, %s1427_s22  }
  0x55   : > { %s1601_s8 = sadd.s32 1, %s1419_s27   ;;  %s32_s18 = sadd.s32 1, %s1415_s26 }
  0x56   : > { %s29_s17 = ssub.s32 %s1419_s27, %s1601_s8  ;;  %p39_p8 = scmp.ne.s32.totalorder %s1415_s26, %s1411_s25 }
  0x57   : > { %p30_p4 = scmp.eq.s32.totalorder %s29_s17, 0  ;;  %p40_p12 = scmp.eq.s32.totalorder %s1419_s27, 0 }
  0x58   : > { %p1112_p6 = scmp.lt.s32.totalorder %s1419_s27, 4  ;;  %p1751_p3 = scmp.eq.s32.totalorder %s1492_s28, 3 }
  0x59   : > { %s1611_s19 = scalar_select %p30_p4, %s1415_s26, %s32_s18  }
  0x5a   : > { %p41_p0 = por %p40_p12, %p39_p8  ;;  %p1615_p5 = por %p1751_p3, %p39_p8 }
  0x5b   : > { %s269_s12 = sand.u32 1, %s1415_s26   ;;  %s988_s21 = sshll.u32 %s1419_s27, 6 }
  0x5c   : > { %s987_s16 = sshll.u32 %s269_s12, 2  ;;  %s1624_s10 = scalar_lea.hbm %s1733_s0, %s988_s21 }
  0x5d   : > { %s273_s11 = scalar_lea.vmem [#allocation2], %s987_s16  ;;  %p1626_p10 = pnand %p1112_p6, %p41_p0 }
  0x5e   : > { %s280_s14 = sshll.u32 %s273_s11, 4  ;;  %s270_s13 = scalar_lea.sflag [#allocation3], %s269_s12  ;;  %s1630_s14 = int_to_ptr.vmem [resolvable:$true] %s280_s14 }
  0x5f   : > { %s1315_s15 = scalar_lea.hbm %s1624_s10, 64  ;;  %p1317_p9 = pneg %p1626_p10 }
  0x60   : > { %p1316_p7 = scmp.ne.s32.totalorder %s1624_s10, %s1315_s15  ;;  %s1320_s21 = scalar_lea.hbm %s1733_s0, 256 }
  0x61   : > { %p1321_p2 = scmp.lt.u32.totalorder %s1624_s10, %s1733_s0  ;;  %p1322_p1 = scmp.lt.u32.totalorder %s1320_s21, %s1315_s15 }
  0x62   : > { %p1318_p11 = pnand %p1317_p9, %p1316_p7  ;;  %p1324_p8 = scmp.lt.u32.totalorder %s1315_s15, %s1624_s10 }
  0x63   : > { %p1323_p4 = por %p1322_p1, %p1321_p2 }
  0x64   : > { %p1319_p13 = pneg %p1318_p11 }
  0x65   : > { %p1325_p12 = por %p1324_p8, %p1323_p4 }
  0x67   : > { %p1326_p6 = pnand %p1325_p12, %p1319_p13 }
  0x69   : > { %1329 = shalt.err (!%p1326_p6)
}
  0x6a   : > { %s1330_s12 = scalar_lea.vmem %s1630_s14, 64  ;;  %s1428_s29 = smov [#allocation2]  }
  0x6b   : > { %p1331_p0 = scmp.ne.s32.totalorder %s1630_s14, %s1330_s12  ;;  %s1335_s11 = sshll.u32 %s1428_s29, 4  ;;  %s1336_s11 = int_to_ptr.vmem [resolvable:$false] %s1335_s11 }
  0x6c   : > { %s1337_s17 = scalar_lea.vmem %s1336_s11, 128  ;;  %p1338_p11 = scmp.lt.s32.totalorder %s1630_s14, %s1336_s11 }
  0x6d   : > { %p1333_p3 = pnand %p1331_p0, %p1317_p9  ;;  %p1339_p2 = scmp.lt.s32.totalorder %s1337_s17, %s1330_s12 }
  0x6f   : > { %p1334_p7 = pneg %p1333_p3  ;;  %p1340_p1 = por %p1339_p2, %p1338_p11 }
  0x71   : > { %p1341_p4 = pnand %p1340_p1, %p1334_p7 }
  0x73   : > { %1344 = shalt.err (!%p1341_p4)
}
  0x74   : > { %1104 = dma.hbm_to_vmem [thread:$0]  (!%p1626_p10), %s1624_s10, 64, %s1630_s14, %s270_s13  }
  0x75   : > { %p1754_p13 = scmp.ne.s32.totalorder %s1748_s9, 0 }
  0x76   : > { %s1660_s15 = sand.u32 (!%p1754_p13), 1, %s1411_s25   ;;  %p1755_p9 = scmp.ne.s32.totalorder (!%p1754_p13), %s1745_s30, 0 }
  0x77   : > { %289 = sbr.rel (%p1754_p13) target bundleno = 867 (0x363), region = 48  ;;  %s990_s18 = sshll.u32 (!%p1754_p13), %s1660_s15, 2 }
  0x78   : > { %s292_s21 = scalar_lea.sflag (!%p1754_p13), [#allocation3], %s1660_s15  ;;  %s295_s16 = scalar_lea.vmem (!%p1754_p13), [#allocation2], %s990_s18 }
  0x7e   : > { %1390 = dma.done.wait (%p1755_p9), %s292_s21, 64  }
  0x7f   : > { %1392 = vsyncadd (%p1755_p9), %s292_s21, 4294967232  ;;  %p1756_p8 = scmp.eq.s32.totalorder %s1492_s28, 0 }
  0x81   : > { %1394 = dma.done.wait (%p1756_p8), [#allocation6], 4608   ;;  %p1757_p10 = pmov %p1756_p8 }
  0x82   : > { %p1758_p12 = pmov %p1756_p8 }
  0x83   : > { %1396 = vsyncadd (%p1757_p10), [#allocation6], 4294962688 }
  0x84   : > { %1398 = dma.done.wait (%p1758_p12), [#allocation9], 2048   ;;  %p1759_p6 = pmov %p1756_p8 }
  0x85   : > { %v1429_v0 = vmov 0   ;;  %v1157_v1 = vld [vmem:[#allocation5 + $0x4] ss:$8 sps:$4 sm:$0xff]   ;;  %v1159_v2 = vld [vmem:[#allocation5] ss:$8 sps:$4 sm:$0xff]   ;;  %vm376_vm0 = vcmask 261120   ;;  %v346_v50 = vlaneseq }
  0x86   : > { %1400 = vsyncadd (%p1759_p6), [#allocation9], 4294965248  ;;  %412 = vmatprep.mubr.bf16.mxu0 %v1429_v0  ;;  %380 = vmatprep.subr.bf16.mxu0 %v1157_v1  ;;  %v1160_v3 = vld [vmem:[#allocation5 + $0x14] ss:$8 sps:$4 sm:$0xff]   ;;  %v1162_v4 = vld [vmem:[#allocation5 + $0x10] ss:$8 sps:$4 sm:$0xff]  }
  0x87   : > { %381 = vmatpush1.bf16.msra.mxu0 %v1159_v2  ;;  %v1163_v5 = vld [vmem:[#allocation7 + $0x4] ss:$8 sps:$4 sm:$0xff]   ;;  %v1165_v6 = vld [vmem:[#allocation7] ss:$8 sps:$4 sm:$0xff]   ;;  %v1166_v7 = vld [vmem:[#allocation7 + $0x14] ss:$8 sps:$4 sm:$0xff]  }
  0x88   : > { %382 = vmatprep.subr.bf16.mxu0 %v1160_v3  ;;  %629 = vmatprep.subr.bf16.mxu1 %v1163_v5  ;;  %v339_v8 = vld [vmem:[%s295_s16] sm:$0xf]  ;;  %v1169_v10 = vld [vmem:[#allocation7 + $0x24] ss:$8 sps:$4 sm:$0xff]   ;;  %v1171_v11 = vld [vmem:[#allocation7 + $0x20] ss:$8 sps:$4 sm:$0xff]  }
  0x89   : > { %630 = vmatpush1.bf16.msra.mxu1 %v1165_v6  ;;  %v1168_v9 = vld [vmem:[#allocation7 + $0x10] ss:$8 sps:$4 sm:$0xff]   ;;  %v1172_v12 = vld [vmem:[#allocation7 + $0x34] ss:$8 sps:$4 sm:$0xff]   ;;  %v1175_v14 = vld [vmem:[#allocation7 + $0x44] ss:$8 sps:$4 sm:$0xff]  }
  0x8a   : > { %631 = vmatprep.subr.bf16.mxu1 %v1166_v7  ;;  %v1174_v13 = vld [vmem:[#allocation7 + $0x30] ss:$8 sps:$4 sm:$0xff]   ;;  %v1177_v15 = vld [vmem:[#allocation7 + $0x40] ss:$8 sps:$4 sm:$0xff]   ;;  %v1178_v16 = vld [vmem:[#allocation7 + $0x54] ss:$8 sps:$4 sm:$0xff]  }
  0x8b   : > { %383 = vmatpush1.bf16.msra.mxu0 %v1162_v4  ;;  %v1180_v17 = vld [vmem:[#allocation7 + $0x50] ss:$8 sps:$4 sm:$0xff]   ;;  %v1181_v18 = vld [vmem:[#allocation7 + $0x64] ss:$8 sps:$4 sm:$0xff]   ;;  %v1183_v19 = vld [vmem:[#allocation7 + $0x60] ss:$8 sps:$4 sm:$0xff]  }
  0x8c   : > { %v1184_v20 = vld [vmem:[#allocation7 + $0x74] ss:$8 sps:$4 sm:$0xff]   ;;  %v1186_v21 = vld [vmem:[#allocation7 + $0x70] ss:$8 sps:$4 sm:$0xff]   ;;  %v1187_v22 = vld [vmem:[#allocation7 + $0x84] ss:$8 sps:$4 sm:$0xff]  }
  0x8d   : > { %632 = vmatpush1.bf16.msra.mxu1 %v1168_v9  ;;  %v1189_v23 = vld [vmem:[#allocation7 + $0x80] ss:$8 sps:$4 sm:$0xff]   ;;  %v1190_v24 = vld [vmem:[#allocation7 + $0x94] ss:$8 sps:$4 sm:$0xff]   ;;  %v1192_v25 = vld [vmem:[#allocation7 + $0x90] ss:$8 sps:$4 sm:$0xff]  }
  0x8e   : > { %999 = vmatmul.mubr.msk.bf16.vlgmr.msra.gmra.mrb[0].mxu0 %vm376_vm0, %v339_v8  ;;  %633 = vmatprep.subr.bf16.mxu1 %v1169_v10  ;;  %v1193_v26 = vld [vmem:[#allocation7 + $0xa4] ss:$8 sps:$4 sm:$0xff]   ;;  %v1195_v27 = vld [vmem:[#allocation7 + $0xa0] ss:$8 sps:$4 sm:$0xff]   ;;  %v1196_v28 = vld [vmem:[#allocation7 + $0xb4] ss:$8 sps:$4 sm:$0xff]  }
  0x8f   : > { %v1198_v29 = vld [vmem:[#allocation7 + $0xb0] ss:$8 sps:$4 sm:$0xff]   ;;  %v1199_v30 = vld [vmem:[#allocation7 + $0xc4] ss:$8 sps:$4 sm:$0xff]   ;;  %v1201_v31 = vld [vmem:[#allocation7 + $0xc0] ss:$8 sps:$4 sm:$0xff]  }
  0x90   : > { %v1202_v32 = vld [vmem:[#allocation7 + $0xd4] ss:$8 sps:$4 sm:$0xff]   ;;  %v1204_v33 = vld [vmem:[#allocation7 + $0xd0] ss:$8 sps:$4 sm:$0xff]   ;;  %v1205_v34 = vld [vmem:[#allocation7 + $0xe4] ss:$8 sps:$4 sm:$0xff]  }
  0x91   : > { %634 = vmatpush1.bf16.msra.mxu1 %v1171_v11  ;;  %v1207_v35 = vld [vmem:[#allocation7 + $0xe0] ss:$8 sps:$4 sm:$0xff]   ;;  %v1208_v36 = vld [vmem:[#allocation7 + $0xf4] ss:$8 sps:$4 sm:$0xff]   ;;  %v1210_v37 = vld [vmem:[#allocation7 + $0xf0] ss:$8 sps:$4 sm:$0xff]  }
  0x92   : > { %635 = vmatprep.subr.bf16.mxu1 %v1172_v12  ;;  %v1211_v38 = vld [vmem:[#allocation8 + $0x40] sm:$0xff]   ;;  %v1213_v40 = vld [vmem:[#allocation8 + $0x48] sm:$0xff]   ;;  %v1215_v42 = vld [vmem:[#allocation8 + $0x50] sm:$0xff]   ;;  %v347_v51 = vshrl.u32 %v346_v50, 7  ;;  %s994_s23 = sshll.u32 %s1660_s15, 3  ;;  %s1050_s12 = sshll.u32 %s1492_s28, 7 }
  0x93   : > { %v1212_v39 = vld [vmem:[#allocation8] sm:$0xff]   ;;  %1053 = vmatprep.subr.bf16.mxu0 %v1211_v38  ;;  %v1214_v41 = vld [vmem:[#allocation8 + $0x8] sm:$0xff]   ;;  %v1216_v43 = vld [vmem:[#allocation8 + $0x10] sm:$0xff]   ;;  %s337_s29 = scalar_lea.vmem [#allocation10], %s994_s23  ;;  %s1690_s21 = scalar_lea.hbm %s1740_s7, %s1050_s12 }
  0x94   : > { %1054 = vmatpush3.bf16.msra.mxu0 %v1212_v39  ;;  %v1217_v44 = vld [vmem:[#allocation8 + $0x58] sm:$0xff]   ;;  %v1219_v46 = vld [vmem:[#allocation8 + $0x60] sm:$0xff]   ;;  %v1221_v48 = vld [vmem:[#allocation8 + $0x68] sm:$0xff]   ;;  %v348_v52 = vsub.s32 0, %v347_v51  ;;  %v352_v54 = vsub.s32 1, %v347_v51  ;;  %s882_s11 = sshll.u32 %s337_s29, 4  ;;  %s1692_s11 = int_to_ptr.vmem [resolvable:$true] %s882_s11 }
  0x95   : > { %636 = vmatpush1.bf16.msra.mxu1 %v1174_v13  ;;  %1055 = vmatprep.subr.bf16.mxu0 %v1213_v40  ;;  %v1218_v45 = vld [vmem:[#allocation8 + $0x18] sm:$0xff]   ;;  %v1220_v47 = vld [vmem:[#allocation8 + $0x20] sm:$0xff]   ;;  %v1222_v49 = vld [vmem:[#allocation8 + $0x28] sm:$0xff]   ;;  %s869_s16 = scalar_lea.sflag [#allocation4], %s1660_s15  ;;  %s1345_s30 = scalar_lea.vmem %s1692_s11, 128 }
  0x96   : > { %637 = vmatprep.subr.bf16.mxu1 %v1175_v14  ;;  %v344_v53 = vld [vmem:[%s1735_s2] sm:$0x3]  ;;  %v1223_v3 = vld [vmem:[#allocation8 + $0x70] sm:$0xff]   ;;  %p1346_p0 = scmp.ne.s32.totalorder %s1692_s11, %s1345_s30  ;;  %s1430_s28 = smov [#allocation10]  }
  0x97   : > { %v349_v55 = vrot.slane %v344_v53, %v348_v52  ;;  %v353_v56 = vrot.slane %v344_v53, %v352_v54  ;;  %v1224_v4 = vld [vmem:[#allocation8 + $0x30] sm:$0xff]   ;;  %v1225_v5 = vld [vmem:[#allocation8 + $0x78] sm:$0xff]   ;;  %s1349_s9 = sshll.u32 %s1430_s28, 4  ;;  %s1350_s9 = int_to_ptr.vmem [resolvable:$false] %s1349_s9 }
  0x98   : > { %1056 = vmatpush3.bf16.msra.mxu0 %v1214_v41  ;;  %v1226_v6 = vld [vmem:[#allocation8 + $0x38] sm:$0xff]   ;;  %p1347_p3 = pnand %p1346_p0, %p1615_p5  ;;  %s1351_s10 = scalar_lea.vmem %s1350_s9, 256 }
  0x99   : > { %638 = vmatpush1.bf16.msra.mxu1 %v1177_v15  ;;  %1057 = vmatprep.subr.bf16.mxu0 %v1215_v42  ;;  %v457_v7 = vld [vmem:[%s1737_s4] sm:$0x3]  ;;  %p1352_p11 = scmp.lt.s32.totalorder %s1692_s11, %s1350_s9  ;;  %p1353_p2 = scmp.lt.s32.totalorder %s1351_s10, %s1345_s30 }
  0x9a   : > { %639 = vmatprep.subr.bf16.mxu1 %v1178_v16  ;;  %v462_v8 = vrot.slane %v457_v7, %v348_v52  ;;  %v466_v9 = vrot.slane %v457_v7, %v352_v54  ;;  %p1348_p7 = pneg %p1347_p3 }
  0x9b   : > { %p1354_p1 = por %p1353_p2, %p1352_p11 }
  0x9c   : > { %1058 = vmatpush3.bf16.msra.mxu0 %v1216_v43 }
  0x9d   : > { %640 = vmatpush1.bf16.msra.mxu1 %v1180_v17  ;;  %1059 = vmatprep.subr.bf16.mxu0 %v1217_v44  ;;  %p1355_p4 = pnand %p1354_p1, %p1348_p7 }
  0x9e   : > { %641 = vmatprep.subr.bf16.mxu1 %v1181_v18 }
  0xa0   : > { %1060 = vmatpush3.bf16.msra.mxu0 %v1218_v45 }
  0xa1   : > { %642 = vmatpush1.bf16.msra.mxu1 %v1183_v19  ;;  %1061 = vmatprep.subr.bf16.mxu0 %v1219_v46 }
  0xa2   : > { %643 = vmatprep.subr.bf16.mxu1 %v1184_v20 }
  0xa4   : > { %1062 = vmatpush3.bf16.msra.mxu0 %v1220_v47 }
  0xa5   : > { %644 = vmatpush1.bf16.msra.mxu1 %v1186_v21  ;;  %1063 = vmatprep.subr.bf16.mxu0 %v1221_v48  ;;  %v1032_v21 = vld [vmem:[%s1739_s6] ss:$0 sm:$0xff] }
  0xa6   : > { %645 = vmatprep.subr.bf16.mxu1 %v1187_v22 }
  0xa8   : > { %1064 = vmatpush3.bf16.msra.mxu0 %v1222_v49 }
  0xa9   : > { %646 = vmatpush1.bf16.msra.mxu1 %v1189_v23  ;;  %1065 = vmatprep.subr.bf16.mxu0 %v1223_v3 }
  0xaa   : > { %647 = vmatprep.subr.bf16.mxu1 %v1190_v24 }
  0xac   : > { %1066 = vmatpush3.bf16.msra.mxu0 %v1224_v4 }
  0xad   : > { %648 = vmatpush1.bf16.msra.mxu1 %v1192_v25  ;;  %1067 = vmatprep.subr.bf16.mxu0 %v1225_v5 }
  0xae   : > { %649 = vmatprep.subr.bf16.mxu1 %v1193_v26 }
  0xb0   : > { %1068 = vmatpush3.bf16.msra.mxu0 %v1226_v6 }
  0xb1   : > { %650 = vmatpush1.bf16.msra.mxu1 %v1195_v27 }
  0xb2   : > { %651 = vmatprep.subr.bf16.mxu1 %v1196_v28 }
  0xb5   : > { %652 = vmatpush1.bf16.msra.mxu1 %v1198_v29 }
  0xb6   : > { %653 = vmatprep.subr.bf16.mxu1 %v1199_v30 }
  0xb9   : > { %654 = vmatpush1.bf16.msra.mxu1 %v1201_v31 }
  0xba   : > { %655 = vmatprep.subr.bf16.mxu1 %v1202_v32 }
  0xbd   : > { %656 = vmatpush1.bf16.msra.mxu1 %v1204_v33 }
  0xbe   : > { %657 = vmatprep.subr.bf16.mxu1 %v1205_v34 }
  0xc1   : > { %658 = vmatpush1.bf16.msra.mxu1 %v1207_v35 }
  0xc2   : > { %659 = vmatprep.subr.bf16.mxu1 %v1208_v36 }
  0xc5   : > { %660 = vmatpush1.bf16.msra.mxu1 %v1210_v37 }
 0x161   : > { %v414_v57 = vpop.f32.mrb[0].mxu0 }
 0x162   : > { %v415_v58 = vadd.f32 %v414_v57, %v349_v55  ;;  %v416_v59 = vpop.f32.mrb[1].mxu0 }
 0x163   : > { %v417_v60 = vadd.f32 %v416_v59, %v353_v56  ;;  %v418_v61 = vpop.f32.mrb[2].mxu0 }
 0x164   : > { %v421_v62 = vmax.f32 %v415_v58, 0.0  ;;  %v419_v63 = vpop.f32.mrb[3].mxu0 }
 0x165   : > { %v422_v0 = vmax.f32 %v417_v60, 0.0 }
 0x166   : > { %v423_v2 = vpack.c.bf16 %v421_v62, %v421_v62 }
 0x167   : > { %v424_v1 = vpack.c.bf16 %v422_v0, %v422_v0 }
 0x169   : > { %661 = vmatprep.mubr.bf16.mxu1 %v424_v1 }
 0x16a   : > { %662 = vmatmul.mubr.bf16.vlgmr.msra.gmra.mrb[0].mxu1 %v423_v2 }
 0x23d   : > { %v663_v10 = vpop.f32.mrb[0].mxu1 }
 0x23e   : > { %v664_v11 = vadd.f32 %v663_v10, %v462_v8  ;;  %v665_v12 = vpop.f32.mrb[1].mxu1 }
 0x23f   : > { %v666_v13 = vadd.f32 %v665_v12, %v466_v9  ;;  %v667_v14 = vpop.f32.mrb[2].mxu1 }
 0x240   : > { %v670_v15 = vmax.f32 %v664_v11, 0.0  ;;  %v668_v16 = vpop.f32.mrb[3].mxu1 }
 0x241   : > { %v671_v17 = vmax.f32 %v666_v13, 0.0 }
 0x242   : > { %v672_v19 = vpack.c.bf16 %v670_v15, %v670_v15 }
 0x243   : > { %v673_v18 = vpack.c.bf16 %v671_v17, %v671_v17 }
 0x245   : > { %841 = vmatprep.mubr.bf16.mxu0 %v673_v18 }
 0x246   : > { %842 = vmatmul.mubr.bf16.vlgmr.msra.gmra.mrb[4].mxu0 %v672_v19 }
 0x319   : > { %v1069_v20 = vpop.f32.mrb[4].mxu0 }
 0x31a   : > { %v1070_v22 = vpop.f32.mrb[5].mxu0 }
 0x31b   : > { %v1071_v23 = vadd.f32 %v1070_v22, %v1069_v20  ;;  %v1072_v24 = vpop.f32.mrb[6].mxu0 }
 0x31c   : > { %v1073_v25 = vpop.f32.mrb[7].mxu0 }
 0x31d   : > { %v844_v26 = vadd.f32 %v1071_v23, %v1032_v21 }
 0x31f   : > { %v849_v27 = vmax.f32 %v844_v26, 0.0 }
 0x321   : > { %v850_v28 = vrot.slane %v849_v27, 4 }
 0x323   : > { %v851_v29 = vmax.f32 %v849_v27, %v850_v28 }
 0x325   : > { %v852_v30 = vrot.slane %v851_v29, 2 }
 0x327   : > { %v853_v31 = vmax.f32 %v851_v29, %v852_v30 }
 0x329   : > { %v854_v32 = vrot.slane %v853_v31, 1 }
 0x32b   : > { %v855_v33 = vmax.f32 %v853_v31, %v854_v32 }
 0x32d   : > { %v856_v34 = vsub.f32 %v849_v27, %v855_v33 }
 0x32f   : > { %v857_v35 = vmul.f32 1.442695, %v856_v34 }
 0x331   : > { %1227 = vpow2.f32 %v857_v35 }
 0x33b   : > { %v1228_v36 = vpop.eup %1227 }
 0x33c   : > { %v859_v37 = vrot.slane %v1228_v36, 4 }
 0x33e   : > { %v860_v38 = vadd.f32 %v1228_v36, %v859_v37 }
 0x340   : > { %v861_v39 = vrot.slane %v860_v38, 2 }
 0x342   : > { %v862_v40 = vadd.f32 %v861_v39, %v860_v38 }
 0x344   : > { %v863_v41 = vrot.slane %v862_v40, 1 }
 0x346   : > { %v864_v42 = vadd.f32 %v863_v41, %v862_v40 }
 0x348   : > { %1229 = vrcp.f32 %v864_v42 }
 0x352   : > { %v1230_v43 = vpop.eup %1229 }
 0x353   : > { %v866_v44 = vmul.f32 %v1230_v43, %v1228_v36 }
 0x355   : > { %867 = vst [vmem:[%s337_s29] sm:$0xff] %v866_v44 }
 0x356   : > { %1358 = shalt.err (!%p1355_p4)
}
 0x357   : > { %s1359_s15 = scalar_lea.hbm %s1690_s21, 128  ;;  %s1363_s13 = scalar_lea.hbm %s1740_s7, 512 }
 0x358   : > { %p1360_p13 = scmp.ne.s32.totalorder %s1690_s21, %s1359_s15  ;;  %p1364_p10 = scmp.lt.u32.totalorder %s1690_s21, %s1740_s7 }
 0x359   : > { %p1365_p12 = scmp.lt.u32.totalorder %s1363_s13, %s1359_s15  ;;  %p1367_p0 = scmp.lt.u32.totalorder %s1359_s15, %s1690_s21 }
 0x35a   : > { %p1361_p9 = pnand %p1360_p13, %p1615_p5 }
 0x35b   : > { %p1366_p6 = por %p1365_p12, %p1364_p10 }
 0x35c   : > { %p1362_p8 = pneg %p1361_p9 }
 0x35d   : > { %p1368_p3 = por %p1367_p0, %p1366_p6 }
 0x35f   : > { %p1369_p7 = pnand %p1368_p3, %p1362_p8 }
 0x361   : > { %1372 = shalt.err (!%p1369_p7)
}
 0x362   : > { %1089 = dma.vmem_to_hbm [thread:$0]  (%p1615_p5), %s1692_s11, 128, %s1690_s21, %s869_s16  }
 0x363 PF: > { %s1760_s29 = sld [smem:[#allocation15_spill]]  ;;  %p1116_p11 = scmp.ge.s32.totalorder %s1419_s27, 2 }
 0x364   : > { %s894_s17 = sand.u32 1, %s1407_s24  }
 0x365   : > { %s895_s18 = scalar_lea.sflag [#allocation4], %s894_s17 }
 0x369   : > { %p1761_p2 = scmp.ne.s32.totalorder %s1760_s29, 0 }
 0x36b   : > { %p1106_p1 = pnand %p1116_p11, %p1761_p2 }
 0x36d   : > { %1402 = dma.done.wait (!%p1106_p1), %s895_s18, 128  }
 0x36e   : > { %1404 = vsyncadd (!%p1106_p1), %s895_s18, 4294967168  ;;  %p22_p4 = scmp.ge.s32.totalorder %s1601_s8, 6   ;;  %s1762_s24 = smov %s1411_s25 }
 0x36f   : > { %s1763_s25 = smov %s1415_s26  ;;  %s1764_s26 = smov %s1611_s19 }
 0x370   : > { %s1765_s27 = smov %s1601_s8  ;;  %24 = sbr.rel (!%p22_p4) target bundleno = 7 (0x7), region = 105 }
 0x377   :  { %900 = vsyncpa [#allocation3], 1 }
 0x378   :  { %902 = vsyncpa [#allocation3 + $0x1], 1 }
 0x379   :  { %903 = vsyncpa [#allocation6], 1 }
 0x37a   :  { %904 = vsyncpa [#allocation9], 1 }
 0x37b   :  { %905 = vsyncpa [#allocation4], 1 }
 0x37c   :  { %907 = vsyncpa [#allocation4 + $0x1], 1 }

</bundles_post_ra>
